<compile_context>
chip_gen: v6e
topology: v6e:2x2x1
jax: 0.10.0
libtpu: 0.0.40
codegen_flags: <defaults>
</compile_context>

<pallas_src>
import functools

import jax
import jax.numpy as jnp
from jax import lax
from jax.experimental import pallas as pl
from jax.experimental.pallas import tpu as pltpu


def _vmem_spec():
    return pl.BlockSpec(memory_space=pltpu.MemorySpace.VMEM)


# --------------------------- fused IGAD kernel ---------------------------
def igad_kernel(adj_ref, feats_ref, pool_gcn_ref, pool_rw_ref,
                gw1_ref, gb1_ref, gw2_ref, gb2_ref,
                wfc_ref, bfc_ref, adjh_ref, feath_ref, wo_ref, bo_ref,
                hw1a_ref, hw1b_ref, hb1_ref, hw2_ref, hb2_ref,
                out_ref, *, input_dim, degrees_dim, max_step):
    f32 = jnp.float32
    adj = adj_ref[...]                                   # [N, N]
    feats_all = feats_ref[...]                           # [N, in + deg]

    # ---------------- feature branch: 2-layer GCN + graph pooling ----------------
    # A @ X first keeps the smaller width (input_dim <= f_hidden_dim) on the
    # N^2-sized matmul.
    x_in = feats_all[:, 0:input_dim]                     # [N, in]
    h = jnp.dot(adj, x_in, preferred_element_type=f32)
    h = jnp.maximum(
        jnp.dot(h, gw1_ref[...], preferred_element_type=f32) + gb1_ref[...], 0.0)
    h = jnp.dot(adj, h, preferred_element_type=f32)
    h = jnp.maximum(
        jnp.dot(h, gw2_ref[...], preferred_element_type=f32) + gb2_ref[...], 0.0)
    out1 = jnp.dot(pool_gcn_ref[...], h, preferred_element_type=f32)   # [Gp, fo]

    # ---------------- topology branch: RW_GNN random-walk kernel ----------------
    degs = feats_all[:, input_dim:input_dim + degrees_dim]             # [N, deg]
    x = jax.nn.sigmoid(
        jnp.dot(degs, wfc_ref[...], preferred_element_type=f32) + bfc_ref[...])  # [N, H]
    z = feath_ref[...]            # [K*S, H]    flattened hidden-graph features
    adjh = adjh_ref[...]          # [K*S, K*S]  block-diagonal hidden adjacency
    pool_rw = pool_rw_ref[...]    # [Gp, N]     graph aggregation (1/|g| folded in)

    nt = (((1,), (1,)), ((), ()))                        # contract last dims: a @ b.T
    zx = lax.dot_general(z, x, nt, preferred_element_type=f32)          # [K*S, N]

    n_graphs_pad = pool_rw_ref.shape[0]
    t_out = bo_ref.shape[1]
    acc = jnp.zeros((n_graphs_pad, t_out), f32)          # [Gp, to] fc1 accumulator
    t = zx
    for step in range(max_step):                         # static unroll (max_step small)
        if step > 0:
            x = jnp.dot(adj, x, preferred_element_type=f32)             # [N, H]
            z = jnp.dot(adjh, z, preferred_element_type=f32)            # [K*S, H]
            t = lax.dot_general(z, x, nt, preferred_element_type=f32)   # [K*S, N]
        tw = zx * t                                                     # [K*S, N]
        tg = lax.dot_general(pool_rw, tw, nt, preferred_element_type=f32)  # [Gp, K*S]
        # wo rows are pre-expanded so this matmul also performs the sum over
        # the S hidden-graph nodes and the concat-over-steps of the original.
        acc = acc + jnp.dot(tg, wo_ref[step], preferred_element_type=f32)  # [Gp, to]
    out2 = jnp.maximum(acc + bo_ref[...], 0.0)                          # [Gp, to]

    # ---------------- head: split-weight MLP (no concatenation) ----------------
    hh = (jnp.dot(out1, hw1a_ref[...], preferred_element_type=f32)
          + jnp.dot(out2, hw1b_ref[...], preferred_element_type=f32)
          + hb1_ref[...])
    hh = jnp.maximum(hh, 0.0)
    # hw2 / hb2 are zero-padded to 128 lanes and the graph axis is padded to a
    # multiple of 8 -> one unmasked lane- and sublane-dense store.
    out_ref[...] = (jnp.dot(hh, hw2_ref[...], preferred_element_type=f32)
                    + hb2_ref[...])


# --------------------------- wrapper / forward ---------------------------
def igad_forward(adj, feats, graph_pool, pool_rw, kp, *,
                 input_dim, degrees_dim, max_step):
    n_graphs = graph_pool.shape[0]
    # pad the graph axis to a multiple of 8 (sublane-dense output / pools);
    # padded pool rows are zero so the extra rows are pure filler.
    g_pad = max(8, ((n_graphs + 7) // 8) * 8)
    if g_pad != n_graphs:
        graph_pool = jnp.pad(graph_pool, ((0, g_pad - n_graphs), (0, 0)))
        pool_rw = jnp.pad(pool_rw, ((0, g_pad - n_graphs), (0, 0)))

    kern = functools.partial(igad_kernel, input_dim=input_dim,
                             degrees_dim=degrees_dim, max_step=max_step)
    out_pad = pl.pallas_call(
        kern,
        out_shape=jax.ShapeDtypeStruct((g_pad, 128), jnp.float32),
        in_specs=[_vmem_spec() for _ in range(19)],
        out_specs=_vmem_spec(),
    )(adj, feats, graph_pool, pool_rw,
      kp["gw1"], kp["gb1"], kp["gw2"], kp["gb2"],
      kp["wfc"], kp["bfc"], kp["adjh_bd"], kp["feath2"], kp["wo_e"], kp["bo"],
      kp["hw1a"], kp["hw1b"], kp["hb1"], kp["hw2p"], kp["hb2p"])
    return out_pad[:n_graphs, :2]


def build_rw_pool(graph_indicator, n_graphs, normalize):
    """[G, N] aggregation matrix for the RW branch, 1/|graph| folded in."""
    onehot = (graph_indicator[:, None] ==
              jnp.arange(n_graphs)[None, :]).astype(jnp.float32)        # [N, G]
    pool = onehot.T                                                     # [G, N]
    if normalize:
        pool = pool / jnp.sum(pool, axis=1, keepdims=True)
    return pool


def prepare_kernel_params(params, cfg):
    """One-time host-side transforms so the kernel never reshapes / concats."""
    K, S = cfg["n_subgraphs"], cfg["size_subgraphs"]
    fo = cfg["f_output_dim"]
    gcn, rw, head = params["gcn"], params["rw"], params["head"]

    # block-diagonal hidden-graph adjacency: [K,S,S] -> [K*S, K*S]
    adjh = rw["adjh"]
    eye = jnp.eye(K, dtype=adjh.dtype)
    adjh_bd = jnp.einsum("kij,kl->kilj", adjh, eye).reshape(K * S, K * S)
    feath2 = rw["feath"].reshape(K * S, -1)                              # [K*S, H]

    # expand fc1 weight: row (step*K + k) repeated S times -> index
    # (step, k*S + s); the kernel's per-step matmul then also performs the
    # sum over hidden-graph nodes and the concat over steps.
    wo_e = jnp.repeat(rw["wo"], S, axis=0).reshape(cfg["max_step"], K * S, -1)

    # split head mlp_1 weight so cat(out1, out2) @ w1 == out1@w1a + out2@w1b
    hw1a = head["w1"][:fo, :]
    hw1b = head["w1"][fo:, :]
    # pad head mlp_2 weight / bias to 128 output lanes (lane-dense store)
    pad = 128 - head["w2"].shape[1]
    hw2p = jnp.pad(head["w2"], ((0, 0), (0, pad)))
    hb2p = jnp.pad(head["b2"], ((0, 0), (0, pad)))

    return dict(gw1=gcn["w1"], gb1=gcn["b1"], gw2=gcn["w2"], gb2=gcn["b2"],
                wfc=rw["wfc"], bfc=rw["bfc"], adjh_bd=adjh_bd, feath2=feath2,
                wo_e=wo_e, bo=rw["bo"],
                hw1a=hw1a, hw1b=hw1b, hb1=head["b1"], hw2p=hw2p, hb2p=hb2p)


# --------------------- deterministic parameter / input setup ---------------------
def init_linear(key, fan_in, fan_out):
    kw, kb = jax.random.split(key)
    lim = 1.0 / (fan_in ** 0.5)
    w = jax.random.uniform(kw, (fan_in, fan_out), minval=-lim, maxval=lim,
                           dtype=jnp.float32)
    b = jax.random.uniform(kb, (1, fan_out), minval=-lim, maxval=lim,
                           dtype=jnp.float32)
    return w, b


def build_params(key, cfg):
    ks = jax.random.split(key, 8)
    # GCN branch
    w1, b1 = init_linear(ks[0], cfg["input_dim"], cfg["f_hidden_dim"])
    w2, b2 = init_linear(ks[1], cfg["f_hidden_dim"], cfg["f_output_dim"])
    gcn = dict(w1=w1, b1=b1, w2=w2, b2=b2)
    # RW_GNN branch: learned hidden sub-graphs
    K, S = cfg["n_subgraphs"], cfg["size_subgraphs"]
    wfc, bfc = init_linear(ks[2], cfg["degrees_dim"], cfg["t_hidden_dim"])
    adjh_raw = jax.random.normal(ks[3], (K, S * (S - 1) // 2), dtype=jnp.float32)
    iu = jnp.triu_indices(S, 1)
    adjh = jnp.zeros((K, S, S), jnp.float32).at[:, iu[0], iu[1]].set(
        jax.nn.relu(adjh_raw))
    adjh = adjh + jnp.transpose(adjh, (0, 2, 1))
    feath = jax.random.normal(ks[4], (K, S, cfg["t_hidden_dim"]), dtype=jnp.float32)
    wo, bo = init_linear(ks[5], K * cfg["max_step"], cfg["t_output_dim"])
    rw = dict(wfc=wfc, bfc=bfc, adjh=adjh, feath=feath, wo=wo, bo=bo)
    # head
    hw1, hb1 = init_linear(ks[6], cfg["f_output_dim"] + cfg["t_output_dim"],
                           cfg["dim_1"])
    hw2, hb2 = init_linear(ks[7], cfg["dim_1"], 2)
    head = dict(w1=hw1, b1=hb1, w2=hw2, b2=hb2)
    return dict(gcn=gcn, rw=rw, head=head)


if __name__ == "__main__":
    cfg = dict(input_dim=8, degrees_dim=8, dim_1=16,
               f_hidden_dim=16, f_output_dim=16,
               t_hidden_dim=16, t_output_dim=16,
               n_subgraphs=4, size_subgraphs=4, max_step=3,
               normalize=True)

    N, G = 32, 4                     # 32 nodes total, 4 graphs of 8 nodes
    key = jax.random.PRNGKey(0)
    k_adj, k_feat, k_param = jax.random.split(key, 3)

    graph_indicator = jnp.repeat(jnp.arange(G, dtype=jnp.int32), N // G)
    # block-diagonal symmetric adjacency (nodes only connect inside their graph)
    a = jax.random.bernoulli(k_adj, 0.3, (N, N)).astype(jnp.float32)
    block = (graph_indicator[:, None] == graph_indicator[None, :]).astype(jnp.float32)
    adj = ((a + a.T) > 0).astype(jnp.float32) * block
    adj = adj * (1.0 - jnp.eye(N, dtype=jnp.float32))   # no self loops

    feats = jax.random.normal(
        k_feat, (N, cfg["input_dim"] + cfg["degrees_dim"]), dtype=jnp.float32)

    # average graph pooling matrix [G, N] for the GCN branch
    onehot = (graph_indicator[:, None] == jnp.arange(G)[None, :]).astype(jnp.float32)
    graph_pool = onehot.T / jnp.sum(onehot, axis=0)[:, None]

    # one-time prep (outside the hot path)
    params = build_params(k_param, cfg)
    kparams = prepare_kernel_params(params, cfg)
    pool_rw = build_rw_pool(graph_indicator, G, cfg["normalize"])

    fwd = jax.jit(functools.partial(
        igad_forward, input_dim=cfg["input_dim"], degrees_dim=cfg["degrees_dim"],
        max_step=cfg["max_step"]))

    out = fwd(adj, feats, graph_pool, pool_rw, kparams)
    out = jax.block_until_ready(out)
    assert out.shape == (G, 2) and out.dtype == jnp.float32
    print("KERNEL_OK")
</pallas_src>

<mosaic_0001>
module attributes {stable_mosaic.version = 11 : i64} {
  func.func @igad_kernel(%arg0: memref<32x32xf32, #tpu.memory_space<vmem>>, %arg1: memref<32x16xf32, #tpu.memory_space<vmem>>, %arg2: memref<8x32xf32, #tpu.memory_space<vmem>>, %arg3: memref<8x32xf32, #tpu.memory_space<vmem>>, %arg4: memref<8x16xf32, #tpu.memory_space<vmem>>, %arg5: memref<1x16xf32, #tpu.memory_space<vmem>>, %arg6: memref<16x16xf32, #tpu.memory_space<vmem>>, %arg7: memref<1x16xf32, #tpu.memory_space<vmem>>, %arg8: memref<8x16xf32, #tpu.memory_space<vmem>>, %arg9: memref<1x16xf32, #tpu.memory_space<vmem>>, %arg10: memref<16x16xf32, #tpu.memory_space<vmem>>, %arg11: memref<16x16xf32, #tpu.memory_space<vmem>>, %arg12: memref<3x16x16xf32, #tpu.memory_space<vmem>>, %arg13: memref<1x16xf32, #tpu.memory_space<vmem>>, %arg14: memref<16x16xf32, #tpu.memory_space<vmem>>, %arg15: memref<16x16xf32, #tpu.memory_space<vmem>>, %arg16: memref<1x16xf32, #tpu.memory_space<vmem>>, %arg17: memref<16x128xf32, #tpu.memory_space<vmem>>, %arg18: memref<1x128xf32, #tpu.memory_space<vmem>>, %arg19: memref<8x128xf32, #tpu.memory_space<vmem>>) attributes {dimension_semantics = [], scalar_prefetch = 0 : i64, scratch_operands = 0 : i64, tpu.core_type = #tpu.core_type<tc>} {
    %c0 = arith.constant 0 : index
    %c0_0 = arith.constant 0 : index
    %0 = vector.load %arg0[%c0, %c0_0] : memref<32x32xf32, #tpu.memory_space<vmem>>, vector<32x32xf32>
    %c0_1 = arith.constant 0 : index
    %c0_2 = arith.constant 0 : index
    %1 = vector.load %arg1[%c0_1, %c0_2] : memref<32x16xf32, #tpu.memory_space<vmem>>, vector<32x16xf32>
    %2 = vector.extract_strided_slice %1 {offsets = [0, 0], sizes = [32, 8], strides = [1, 1]} : vector<32x16xf32> to vector<32x8xf32>
    %cst = arith.constant dense<0.000000e+00> : vector<32x8xf32>
    %3 = tpu.matmul %0, %2, %cst {dimension_numbers = #tpu.dot_dimension_numbers<[1], [0], [0], [1], [0, 0, 1, 1], [], []>} : vector<32x32xf32>, vector<32x8xf32>, vector<32x8xf32> -> vector<32x8xf32>
    %c0_3 = arith.constant 0 : index
    %c0_4 = arith.constant 0 : index
    %4 = vector.load %arg4[%c0_3, %c0_4] : memref<8x16xf32, #tpu.memory_space<vmem>>, vector<8x16xf32>
    %cst_5 = arith.constant dense<0.000000e+00> : vector<32x16xf32>
    %5 = tpu.matmul %3, %4, %cst_5 {dimension_numbers = #tpu.dot_dimension_numbers<[1], [0], [0], [1], [0, 0, 1, 1], [], []>} : vector<32x8xf32>, vector<8x16xf32>, vector<32x16xf32> -> vector<32x16xf32>
    %c0_6 = arith.constant 0 : index
    %c0_7 = arith.constant 0 : index
    %6 = vector.load %arg5[%c0_6, %c0_7] : memref<1x16xf32, #tpu.memory_space<vmem>>, vector<1x16xf32>
    %7 = vector.broadcast %6 : vector<1x16xf32> to vector<32x16xf32>
    %8 = arith.addf %5, %7 : vector<32x16xf32>
    %cst_8 = arith.constant 0.000000e+00 : f32
    %9 = vector.broadcast %cst_8 : f32 to vector<32x16xf32>
    %10 = arith.maximumf %8, %9 : vector<32x16xf32>
    %cst_9 = arith.constant dense<0.000000e+00> : vector<32x16xf32>
    %11 = tpu.matmul %0, %10, %cst_9 {dimension_numbers = #tpu.dot_dimension_numbers<[1], [0], [0], [1], [0, 0, 1, 1], [], []>} : vector<32x32xf32>, vector<32x16xf32>, vector<32x16xf32> -> vector<32x16xf32>
    %c0_10 = arith.constant 0 : index
    %c0_11 = arith.constant 0 : index
    %12 = vector.load %arg6[%c0_10, %c0_11] : memref<16x16xf32, #tpu.memory_space<vmem>>, vector<16x16xf32>
    %cst_12 = arith.constant dense<0.000000e+00> : vector<32x16xf32>
    %13 = tpu.matmul %11, %12, %cst_12 {dimension_numbers = #tpu.dot_dimension_numbers<[1], [0], [0], [1], [0, 0, 1, 1], [], []>} : vector<32x16xf32>, vector<16x16xf32>, vector<32x16xf32> -> vector<32x16xf32>
    %c0_13 = arith.constant 0 : index
    %c0_14 = arith.constant 0 : index
    %14 = vector.load %arg7[%c0_13, %c0_14] : memref<1x16xf32, #tpu.memory_space<vmem>>, vector<1x16xf32>
    %15 = vector.broadcast %14 : vector<1x16xf32> to vector<32x16xf32>
    %16 = arith.addf %13, %15 : vector<32x16xf32>
    %cst_15 = arith.constant 0.000000e+00 : f32
    %17 = vector.broadcast %cst_15 : f32 to vector<32x16xf32>
    %18 = arith.maximumf %16, %17 : vector<32x16xf32>
    %c0_16 = arith.constant 0 : index
    %c0_17 = arith.constant 0 : index
    %19 = vector.load %arg2[%c0_16, %c0_17] : memref<8x32xf32, #tpu.memory_space<vmem>>, vector<8x32xf32>
    %cst_18 = arith.constant dense<0.000000e+00> : vector<8x16xf32>
    %20 = tpu.matmul %19, %18, %cst_18 {dimension_numbers = #tpu.dot_dimension_numbers<[1], [0], [0], [1], [0, 0, 1, 1], [], []>} : vector<8x32xf32>, vector<32x16xf32>, vector<8x16xf32> -> vector<8x16xf32>
    %21 = vector.extract_strided_slice %1 {offsets = [0, 8], sizes = [32, 8], strides = [1, 1]} : vector<32x16xf32> to vector<32x8xf32>
    %c0_19 = arith.constant 0 : index
    %c0_20 = arith.constant 0 : index
    %22 = vector.load %arg8[%c0_19, %c0_20] : memref<8x16xf32, #tpu.memory_space<vmem>>, vector<8x16xf32>
    %cst_21 = arith.constant dense<0.000000e+00> : vector<32x16xf32>
    %23 = tpu.matmul %21, %22, %cst_21 {dimension_numbers = #tpu.dot_dimension_numbers<[1], [0], [0], [1], [0, 0, 1, 1], [], []>} : vector<32x8xf32>, vector<8x16xf32>, vector<32x16xf32> -> vector<32x16xf32>
    %c0_22 = arith.constant 0 : index
    %c0_23 = arith.constant 0 : index
    %24 = vector.load %arg9[%c0_22, %c0_23] : memref<1x16xf32, #tpu.memory_space<vmem>>, vector<1x16xf32>
    %25 = vector.broadcast %24 : vector<1x16xf32> to vector<32x16xf32>
    %26 = arith.addf %23, %25 : vector<32x16xf32>
    %27 = arith.negf %26 : vector<32x16xf32>
    %28 = math.exp %27 : vector<32x16xf32>
    %cst_24 = arith.constant 1.000000e+00 : f32
    %29 = vector.broadcast %cst_24 : f32 to vector<32x16xf32>
    %30 = arith.addf %29, %28 : vector<32x16xf32>
    %31 = arith.divf %29, %30 : vector<32x16xf32>
    %c0_25 = arith.constant 0 : index
    %c0_26 = arith.constant 0 : index
    %32 = vector.load %arg11[%c0_25, %c0_26] : memref<16x16xf32, #tpu.memory_space<vmem>>, vector<16x16xf32>
    %c0_27 = arith.constant 0 : index
    %c0_28 = arith.constant 0 : index
    %33 = vector.load %arg10[%c0_27, %c0_28] : memref<16x16xf32, #tpu.memory_space<vmem>>, vector<16x16xf32>
    %c0_29 = arith.constant 0 : index
    %c0_30 = arith.constant 0 : index
    %34 = vector.load %arg3[%c0_29, %c0_30] : memref<8x32xf32, #tpu.memory_space<vmem>>, vector<8x32xf32>
    %cst_31 = arith.constant dense<0.000000e+00> : vector<16x32xf32>
    %35 = tpu.matmul %32, %31, %cst_31 {dimension_numbers = #tpu.dot_dimension_numbers<[1], [1], [0], [0], [0, 0, 1, 0], [], []>} : vector<16x16xf32>, vector<32x16xf32>, vector<16x32xf32> -> vector<16x32xf32>
    %cst_32 = arith.constant 0.000000e+00 : f32
    %36 = vector.broadcast %cst_32 : f32 to vector<8x16xf32>
    %37 = arith.mulf %35, %35 : vector<16x32xf32>
    %cst_33 = arith.constant dense<0.000000e+00> : vector<8x16xf32>
    %38 = tpu.matmul %34, %37, %cst_33 {dimension_numbers = #tpu.dot_dimension_numbers<[1], [1], [0], [0], [0, 0, 1, 0], [], []>} : vector<8x32xf32>, vector<16x32xf32>, vector<8x16xf32> -> vector<8x16xf32>
    %c0_34 = arith.constant 0 : index
    %c0_35 = arith.constant 0 : index
    %c0_36 = arith.constant 0 : index
    %39 = vector.load %arg12[%c0_34, %c0_35, %c0_36] : memref<3x16x16xf32, #tpu.memory_space<vmem>>, vector<1x16x16xf32>
    %40 = vector.shape_cast %39 : vector<1x16x16xf32> to vector<16x16xf32>
    %cst_37 = arith.constant dense<0.000000e+00> : vector<8x16xf32>
    %41 = tpu.matmul %38, %40, %cst_37 {dimension_numbers = #tpu.dot_dimension_numbers<[1], [0], [0], [1], [0, 0, 1, 1], [], []>} : vector<8x16xf32>, vector<16x16xf32>, vector<8x16xf32> -> vector<8x16xf32>
    %42 = arith.addf %36, %41 : vector<8x16xf32>
    %cst_38 = arith.constant dense<0.000000e+00> : vector<32x16xf32>
    %43 = tpu.matmul %0, %31, %cst_38 {dimension_numbers = #tpu.dot_dimension_numbers<[1], [0], [0], [1], [0, 0, 1, 1], [], []>} : vector<32x32xf32>, vector<32x16xf32>, vector<32x16xf32> -> vector<32x16xf32>
    %cst_39 = arith.constant dense<0.000000e+00> : vector<16x16xf32>
    %44 = tpu.matmul %33, %32, %cst_39 {dimension_numbers = #tpu.dot_dimension_numbers<[1], [0], [0], [1], [0, 0, 1, 1], [], []>} : vector<16x16xf32>, vector<16x16xf32>, vector<16x16xf32> -> vector<16x16xf32>
    %cst_40 = arith.constant dense<0.000000e+00> : vector<16x32xf32>
    %45 = tpu.matmul %44, %43, %cst_40 {dimension_numbers = #tpu.dot_dimension_numbers<[1], [1], [0], [0], [0, 0, 1, 0], [], []>} : vector<16x16xf32>, vector<32x16xf32>, vector<16x32xf32> -> vector<16x32xf32>
    %46 = arith.mulf %35, %45 : vector<16x32xf32>
    %cst_41 = arith.constant dense<0.000000e+00> : vector<8x16xf32>
    %47 = tpu.matmul %34, %46, %cst_41 {dimension_numbers = #tpu.dot_dimension_numbers<[1], [1], [0], [0], [0, 0, 1, 0], [], []>} : vector<8x32xf32>, vector<16x32xf32>, vector<8x16xf32> -> vector<8x16xf32>
    %c1 = arith.constant 1 : index
    %c0_42 = arith.constant 0 : index
    %c0_43 = arith.constant 0 : index
    %48 = vector.load %arg12[%c1, %c0_42, %c0_43] : memref<3x16x16xf32, #tpu.memory_space<vmem>>, vector<1x16x16xf32>
    %49 = vector.shape_cast %48 : vector<1x16x16xf32> to vector<16x16xf32>
    %cst_44 = arith.constant dense<0.000000e+00> : vector<8x16xf32>
    %50 = tpu.matmul %47, %49, %cst_44 {dimension_numbers = #tpu.dot_dimension_numbers<[1], [0], [0], [1], [0, 0, 1, 1], [], []>} : vector<8x16xf32>, vector<16x16xf32>, vector<8x16xf32> -> vector<8x16xf32>
    %51 = arith.addf %42, %50 : vector<8x16xf32>
    %cst_45 = arith.constant dense<0.000000e+00> : vector<32x16xf32>
    %52 = tpu.matmul %0, %43, %cst_45 {dimension_numbers = #tpu.dot_dimension_numbers<[1], [0], [0], [1], [0, 0, 1, 1], [], []>} : vector<32x32xf32>, vector<32x16xf32>, vector<32x16xf32> -> vector<32x16xf32>
    %cst_46 = arith.constant dense<0.000000e+00> : vector<16x16xf32>
    %53 = tpu.matmul %33, %44, %cst_46 {dimension_numbers = #tpu.dot_dimension_numbers<[1], [0], [0], [1], [0, 0, 1, 1], [], []>} : vector<16x16xf32>, vector<16x16xf32>, vector<16x16xf32> -> vector<16x16xf32>
    %cst_47 = arith.constant dense<0.000000e+00> : vector<16x32xf32>
    %54 = tpu.matmul %53, %52, %cst_47 {dimension_numbers = #tpu.dot_dimension_numbers<[1], [1], [0], [0], [0, 0, 1, 0], [], []>} : vector<16x16xf32>, vector<32x16xf32>, vector<16x32xf32> -> vector<16x32xf32>
    %55 = arith.mulf %35, %54 : vector<16x32xf32>
    %cst_48 = arith.constant dense<0.000000e+00> : vector<8x16xf32>
    %56 = tpu.matmul %34, %55, %cst_48 {dimension_numbers = #tpu.dot_dimension_numbers<[1], [1], [0], [0], [0, 0, 1, 0], [], []>} : vector<8x32xf32>, vector<16x32xf32>, vector<8x16xf32> -> vector<8x16xf32>
    %c2 = arith.constant 2 : index
    %c0_49 = arith.constant 0 : index
    %c0_50 = arith.constant 0 : index
    %57 = vector.load %arg12[%c2, %c0_49, %c0_50] : memref<3x16x16xf32, #tpu.memory_space<vmem>>, vector<1x16x16xf32>
    %58 = vector.shape_cast %57 : vector<1x16x16xf32> to vector<16x16xf32>
    %cst_51 = arith.constant dense<0.000000e+00> : vector<8x16xf32>
    %59 = tpu.matmul %56, %58, %cst_51 {dimension_numbers = #tpu.dot_dimension_numbers<[1], [0], [0], [1], [0, 0, 1, 1], [], []>} : vector<8x16xf32>, vector<16x16xf32>, vector<8x16xf32> -> vector<8x16xf32>
    %60 = arith.addf %51, %59 : vector<8x16xf32>
    %c0_52 = arith.constant 0 : index
    %c0_53 = arith.constant 0 : index
    %61 = vector.load %arg13[%c0_52, %c0_53] : memref<1x16xf32, #tpu.memory_space<vmem>>, vector<1x16xf32>
    %62 = vector.broadcast %61 : vector<1x16xf32> to vector<8x16xf32>
    %63 = arith.addf %60, %62 : vector<8x16xf32>
    %cst_54 = arith.constant 0.000000e+00 : f32
    %64 = vector.broadcast %cst_54 : f32 to vector<8x16xf32>
    %65 = arith.maximumf %63, %64 : vector<8x16xf32>
    %c0_55 = arith.constant 0 : index
    %c0_56 = arith.constant 0 : index
    %66 = vector.load %arg14[%c0_55, %c0_56] : memref<16x16xf32, #tpu.memory_space<vmem>>, vector<16x16xf32>
    %cst_57 = arith.constant dense<0.000000e+00> : vector<8x16xf32>
    %67 = tpu.matmul %20, %66, %cst_57 {dimension_numbers = #tpu.dot_dimension_numbers<[1], [0], [0], [1], [0, 0, 1, 1], [], []>} : vector<8x16xf32>, vector<16x16xf32>, vector<8x16xf32> -> vector<8x16xf32>
    %c0_58 = arith.constant 0 : index
    %c0_59 = arith.constant 0 : index
    %68 = vector.load %arg15[%c0_58, %c0_59] : memref<16x16xf32, #tpu.memory_space<vmem>>, vector<16x16xf32>
    %cst_60 = arith.constant dense<0.000000e+00> : vector<8x16xf32>
    %69 = tpu.matmul %65, %68, %cst_60 {dimension_numbers = #tpu.dot_dimension_numbers<[1], [0], [0], [1], [0, 0, 1, 1], [], []>} : vector<8x16xf32>, vector<16x16xf32>, vector<8x16xf32> -> vector<8x16xf32>
    %70 = arith.addf %67, %69 : vector<8x16xf32>
    %c0_61 = arith.constant 0 : index
    %c0_62 = arith.constant 0 : index
    %71 = vector.load %arg16[%c0_61, %c0_62] : memref<1x16xf32, #tpu.memory_space<vmem>>, vector<1x16xf32>
    %72 = vector.broadcast %71 : vector<1x16xf32> to vector<8x16xf32>
    %73 = arith.addf %70, %72 : vector<8x16xf32>
    %cst_63 = arith.constant 0.000000e+00 : f32
    %74 = vector.broadcast %cst_63 : f32 to vector<8x16xf32>
    %75 = arith.maximumf %73, %74 : vector<8x16xf32>
    %c0_64 = arith.constant 0 : index
    %c0_65 = arith.constant 0 : index
    %76 = vector.load %arg17[%c0_64, %c0_65] : memref<16x128xf32, #tpu.memory_space<vmem>>, vector<16x128xf32>
    %cst_66 = arith.constant dense<0.000000e+00> : vector<8x128xf32>
    %77 = tpu.matmul %75, %76, %cst_66 {dimension_numbers = #tpu.dot_dimension_numbers<[1], [0], [0], [1], [0, 0, 1, 1], [], []>} : vector<8x16xf32>, vector<16x128xf32>, vector<8x128xf32> -> vector<8x128xf32>
    %c0_67 = arith.constant 0 : index
    %c0_68 = arith.constant 0 : index
    %78 = vector.load %arg18[%c0_67, %c0_68] : memref<1x128xf32, #tpu.memory_space<vmem>>, vector<1x128xf32>
    %79 = vector.broadcast %78 : vector<1x128xf32> to vector<8x128xf32>
    %80 = arith.addf %77, %79 : vector<8x128xf32>
    %c0_69 = arith.constant 0 : index
    %c0_70 = arith.constant 0 : index
    %81 = vector.load %arg19[%c0_69, %c0_70] : memref<8x128xf32, #tpu.memory_space<vmem>>, vector<8x128xf32>
    tpu.vector_store %arg19[%c0_69, %c0_70], %80 {strides = array<i32>} : memref<8x128xf32, #tpu.memory_space<vmem>>, vector<8x128xf32>,
    return
  }
}

</mosaic_0001>

<bundles_post_ra>
// kernel: igad_forward.1
= control target key start
LH: loop header
LB: loop body
LE: loop exit
PB: predicated region body
PF: predicated region fallthrough
CT: control target
= control target key end

     0   :  { %s3225_s0 = inlined_call_operand.vmem [shape: f32[32,32], index: 0, kind: input, shape index: {}]   ;;  %s3226_s1 = inlined_call_operand.vmem [shape: f32[32,16], index: 1, kind: input, shape index: {}]   ;;  %s3227_s2 = inlined_call_operand.vmem [shape: f32[8,32], index: 2, kind: input, shape index: {}]   ;;  %s3228_s3 = inlined_call_operand.vmem [shape: f32[8,32], index: 3, kind: input, shape index: {}]   ;;  %s3229_s4 = inlined_call_operand.hbm [shape: f32[8,16], index: 4, kind: input, shape index: {}]   ;;  %s3230_s5 = inlined_call_operand.vmem [shape: f32[1,16], index: 5, kind: input, shape index: {}]   ;;  %s3231_s6 = inlined_call_operand.hbm [shape: f32[16,16], index: 6, kind: input, shape index: {}]   ;;  %s3232_s7 = inlined_call_operand.hbm [shape: f32[1,16], index: 7, kind: input, shape index: {}]   ;;  %s3233_s8 = inlined_call_operand.vmem [shape: f32[8,16], index: 8, kind: input, shape index: {}]   ;;  %s3234_s9 = inlined_call_operand.hbm [shape: f32[1,16], index: 9, kind: input, shape index: {}]   ;;  %s3235_s10 = inlined_call_operand.hbm [shape: f32[16,16], index: 10, kind: input, shape index: {}]   ;;  %s3236_s11 = inlined_call_operand.hbm [shape: f32[16,16], index: 11, kind: input, shape index: {}]   ;;  %s3237_s12 = inlined_call_operand.vmem [shape: f32[3,16,16], index: 12, kind: input, shape index: {}]   ;;  %s3238_s13 = inlined_call_operand.hbm [shape: f32[1,16], index: 13, kind: input, shape index: {}]   ;;  %s3239_s14 = inlined_call_operand.vmem [shape: f32[16,16], index: 14, kind: input, shape index: {}]   ;;  %s3240_s15 = inlined_call_operand.hbm [shape: f32[16,16], index: 15, kind: input, shape index: {}]   ;;  %s3241_s16 = inlined_call_operand.hbm [shape: f32[1,16], index: 16, kind: input, shape index: {}]   ;;  %s3242_s17 = inlined_call_operand.hbm [shape: f32[16,128], index: 17, kind: input, shape index: {}]   ;;  %s3243_s18 = inlined_call_operand.hbm [shape: f32[1,128], index: 18, kind: input, shape index: {}]   ;;  %s3244_s19 = inlined_call_operand.vmem [shape: f32[8,128], index: 19, kind: output, shape index: {}]  }
   0x1   :  { %3247 = sst [smem:[#allocation25_spill]] %s3225_s0 }
   0x2   :  { %3248 = sst [smem:[#allocation26_spill]] %s3226_s1 }
   0x3   :  { %3249 = sst [smem:[#allocation27_spill]] %s3227_s2 }
   0x4   :  { %3250 = sst [smem:[#allocation28_spill]] %s3228_s3 }
   0x5   :  { %24 = vsyncpa [#allocation3], 0 }
   0x6   :  { %25 = vsyncpa [#allocation5], 0 }
   0x7   :  { %26 = vsyncpa [#allocation8], 0 }
   0x8   :  { %27 = vsyncpa [#allocation11], 0 }
   0x9   :  { %28 = vsyncpa [#allocation14], 0 }
   0xa   :  { %29 = vsyncpa [#allocation17], 0  ;;  %s2811_s0 = smov [#allocation4]  }
   0xb   :  { %s55_s30 = sshll.u32 %s2811_s0, 4  ;;  %s56_s30 = int_to_ptr.vmem [resolvable:$true] %s55_s30 }
   0xc   :  { %s2587_s20 = scalar_lea.vmem %s56_s30, 256  ;;  %p2592_p1 = scmp.lt.s32.totalorder %s56_s30, %s56_s30 }
   0xd   :  { %p2588_p0 = scmp.ne.s32.totalorder %s56_s30, %s2587_s20  ;;  %p2593_p2 = scmp.lt.s32.totalorder %s2587_s20, %s2587_s20 }
   0xf   :  { %p2594_p3 = por %p2593_p2, %p2592_p1 }
  0x11   :  { %p2595_p4 = pnand %p2594_p3, %p2588_p0 }
  0x13   :  { %2598 = shalt.err (!%p2595_p4)
}
  0x14   :  { %s2812_s21 = smov 128   ;;  %s2813_s1 = smov 8  }
  0x15   :  { %61 = dma.hbm_to_vmem [thread:$0]  %s3231_s6, 256, %s56_s30, [#allocation5], %s2812_s21, %s2812_s21, %s2813_s1  }
  0x16   :  { %s2814_s23 = smov [#allocation7]   ;;  %s2815_s25 = smov [#allocation10]  }
  0x17   :  { %s80_s24 = sshll.u32 %s2814_s23, 4  ;;  %s101_s3 = sshll.u32 %s2815_s25, 4  ;;  %s81_s24 = int_to_ptr.vmem [resolvable:$true] %s80_s24  ;;  %s102_s3 = int_to_ptr.vmem [resolvable:$true] %s101_s3 }
  0x18   :  { %s2607_s26 = scalar_lea.vmem %s81_s24, 16  ;;  %s2611_s27 = scalar_lea.vmem %s81_s24, 32 }
  0x19   :  { %p2608_p5 = scmp.ne.s32.totalorder %s81_s24, %s2607_s26  ;;  %p2612_p6 = scmp.lt.s32.totalorder %s81_s24, %s81_s24 }
  0x1a   :  { %p2613_p7 = scmp.lt.s32.totalorder %s2611_s27, %s2607_s26 }
  0x1c   :  { %p2614_p8 = por %p2613_p7, %p2612_p6 }
  0x1e   :  { %p2615_p9 = pnand %p2614_p8, %p2608_p5 }
  0x20   :  { %2618 = shalt.err (!%p2615_p9)
}
  0x21   :  { %83 = dma.hbm_to_vmem [thread:$0]  %s3234_s9, 16, %s81_s24, [#allocation8]  }
  0x22   :  { %s2627_s0 = scalar_lea.vmem %s102_s3, 256  ;;  %p2632_p11 = scmp.lt.s32.totalorder %s102_s3, %s102_s3 }
  0x23   :  { %p2628_p10 = scmp.ne.s32.totalorder %s102_s3, %s2627_s0  ;;  %p2633_p12 = scmp.lt.s32.totalorder %s2627_s0, %s2627_s0 }
  0x25   :  { %p2634_p13 = por %p2633_p12, %p2632_p11 }
  0x27   :  { %p2635_p0 = pnand %p2634_p13, %p2628_p10 }
  0x29   :  { %2638 = shalt.err (!%p2635_p0)
}
  0x2a   :  { %107 = dma.hbm_to_vmem [thread:$0]  %s3236_s11, 256, %s102_s3, [#allocation11], %s2812_s21, %s2812_s21, %s2813_s1  }
  0x2b   :  { %s2816_s20 = smov [#allocation13]   ;;  %s2817_s2 = smov [#allocation16]  }
  0x2c   :  { %s127_s22 = sshll.u32 %s2816_s20, 4  ;;  %s149_s9 = sshll.u32 %s2817_s2, 4  ;;  %s128_s22 = int_to_ptr.vmem [resolvable:$true] %s127_s22  ;;  %s150_s9 = int_to_ptr.vmem [resolvable:$true] %s149_s9 }
  0x2d   :  { %s2647_s23 = scalar_lea.vmem %s128_s22, 256  ;;  %p2652_p2 = scmp.lt.s32.totalorder %s128_s22, %s128_s22 }
  0x2e   :  { %p2648_p1 = scmp.ne.s32.totalorder %s128_s22, %s2647_s23  ;;  %p2653_p3 = scmp.lt.s32.totalorder %s2647_s23, %s2647_s23 }
  0x30   :  { %p2654_p4 = por %p2653_p3, %p2652_p2 }
  0x32   :  { %p2655_p5 = pnand %p2654_p4, %p2648_p1 }
  0x34   :  { %2658 = shalt.err (!%p2655_p5)
}
  0x35   :  { %133 = dma.hbm_to_vmem [thread:$0]  %s3240_s15, 256, %s128_s22, [#allocation14], %s2812_s21, %s2812_s21, %s2813_s1  }
  0x36   :  { %s2667_s11 = scalar_lea.vmem %s150_s9, 256  ;;  %p2672_p7 = scmp.lt.s32.totalorder %s150_s9, %s150_s9 }
  0x37   :  { %p2668_p6 = scmp.ne.s32.totalorder %s150_s9, %s2667_s11  ;;  %p2673_p8 = scmp.lt.s32.totalorder %s2667_s11, %s2667_s11 }
  0x39   :  { %p2674_p9 = por %p2673_p8, %p2672_p7 }
  0x3b   :  { %p2675_p10 = pnand %p2674_p9, %p2668_p6 }
  0x3d   :  { %2678 = shalt.err (!%p2675_p10)
}
  0x3e   :  { %155 = dma.hbm_to_vmem [thread:$0]  %s3242_s17, 256, %s150_s9, [#allocation17], %s2812_s21, %s2812_s21, %s2813_s1  }
  0x3f   :  { %s2818_s27 = smov [#allocation2]   ;;  %s2819_s29 = smov [#allocation6]  }
  0x40   :  { %s44_s28 = sshll.u32 %s2818_s27, 4  ;;  %s68_s15 = sshll.u32 %s2819_s29, 4  ;;  %s45_s28 = int_to_ptr.vmem [resolvable:$true] %s44_s28  ;;  %s69_s15 = int_to_ptr.vmem [resolvable:$true] %s68_s15 }
  0x41   :  { %s2687_s0 = scalar_lea.vmem %s45_s28, 128  ;;  %p2692_p12 = scmp.lt.s32.totalorder %s45_s28, %s45_s28 }
  0x42   :  { %p2688_p11 = scmp.ne.s32.totalorder %s45_s28, %s2687_s0  ;;  %p2693_p13 = scmp.lt.s32.totalorder %s2687_s0, %s2687_s0 }
  0x44   :  { %p2694_p0 = por %p2693_p13, %p2692_p12 }
  0x46   :  { %p2695_p1 = pnand %p2694_p0, %p2688_p11 }
  0x48   :  { %2698 = shalt.err (!%p2695_p1)
}
  0x49   :  { %47 = dma.hbm_to_vmem [thread:$0]  %s3229_s4, 128, %s45_s28, [#allocation3]  }
  0x4a   :  { %s2707_s20 = scalar_lea.vmem %s69_s15, 16  ;;  %s2711_s17 = scalar_lea.vmem %s69_s15, 32 }
  0x4b   :  { %p2708_p2 = scmp.ne.s32.totalorder %s69_s15, %s2707_s20  ;;  %p2712_p3 = scmp.lt.s32.totalorder %s69_s15, %s69_s15 }
  0x4c   :  { %p2713_p4 = scmp.lt.s32.totalorder %s2711_s17, %s2707_s20 }
  0x4e   :  { %p2714_p5 = por %p2713_p4, %p2712_p3 }
  0x50   :  { %p2715_p6 = pnand %p2714_p5, %p2708_p2 }
  0x52   :  { %2718 = shalt.err (!%p2715_p6)
}
  0x53   :  { %71 = dma.hbm_to_vmem [thread:$0]  %s3232_s7, 16, %s69_s15, [#allocation5]  }
  0x54   :  { %s2820_s9 = smov [#allocation9]   ;;  %s2821_s24 = smov [#allocation12]  }
  0x55   :  { %s89_s23 = sshll.u32 %s2820_s9, 4  ;;  %s116_s25 = sshll.u32 %s2821_s24, 4  ;;  %s90_s23 = int_to_ptr.vmem [resolvable:$true] %s89_s23  ;;  %s117_s25 = int_to_ptr.vmem [resolvable:$true] %s116_s25 }
  0x56   :  { %s2727_s11 = scalar_lea.vmem %s90_s23, 256  ;;  %p2732_p8 = scmp.lt.s32.totalorder %s90_s23, %s90_s23 }
  0x57   :  { %p2728_p7 = scmp.ne.s32.totalorder %s90_s23, %s2727_s11  ;;  %p2733_p9 = scmp.lt.s32.totalorder %s2727_s11, %s2727_s11 }
  0x59   :  { %p2734_p10 = por %p2733_p9, %p2732_p8 }
  0x5b   :  { %p2735_p11 = pnand %p2734_p10, %p2728_p7 }
  0x5d   :  { %2738 = shalt.err (!%p2735_p11)
}
  0x5e   :  { %95 = dma.hbm_to_vmem [thread:$0]  %s3235_s10, 256, %s90_s23, [#allocation8], %s2812_s21, %s2812_s21, %s2813_s1  }
  0x5f   :  { %s2747_s7 = scalar_lea.vmem %s117_s25, 16  ;;  %s2751_s26 = scalar_lea.vmem %s117_s25, 32 }
  0x60   :  { %p2748_p12 = scmp.ne.s32.totalorder %s117_s25, %s2747_s7  ;;  %p2752_p13 = scmp.lt.s32.totalorder %s117_s25, %s117_s25 }
  0x61   :  { %p2753_p0 = scmp.lt.s32.totalorder %s2751_s26, %s2747_s7 }
  0x63   :  { %p2754_p1 = por %p2753_p0, %p2752_p13 }
  0x65   :  { %p2755_p2 = pnand %p2754_p1, %p2748_p12 }
  0x67   :  { %2758 = shalt.err (!%p2755_p2)
}
  0x68   :  { %119 = dma.hbm_to_vmem [thread:$0]  %s3238_s13, 16, %s117_s25, [#allocation11]  }
  0x69   :  { %s2822_s29 = smov [#allocation15]   ;;  %s2823_s0 = smov [#allocation18]  }
  0x6a   :  { %s140_s15 = sshll.u32 %s2822_s29, 4  ;;  %s162_s6 = sshll.u32 %s2823_s0, 4  ;;  %s141_s15 = int_to_ptr.vmem [resolvable:$true] %s140_s15  ;;  %s163_s6 = int_to_ptr.vmem [resolvable:$true] %s162_s6 }
  0x6b   :  { %s2767_s30 = scalar_lea.vmem %s141_s15, 16  ;;  %s2771_s10 = scalar_lea.vmem %s141_s15, 32 }
  0x6c   :  { %p2768_p3 = scmp.ne.s32.totalorder %s141_s15, %s2767_s30  ;;  %p2772_p4 = scmp.lt.s32.totalorder %s141_s15, %s141_s15 }
  0x6d   :  { %p2773_p5 = scmp.lt.s32.totalorder %s2771_s10, %s2767_s30 }
  0x6f   :  { %p2774_p6 = por %p2773_p5, %p2772_p4 }
  0x71   :  { %p2775_p7 = pnand %p2774_p6, %p2768_p3 }
  0x73   :  { %2778 = shalt.err (!%p2775_p7)
}
  0x74   :  { %143 = dma.hbm_to_vmem [thread:$0]  %s3241_s16, 16, %s141_s15, [#allocation14]  }
  0x75   :  { %s2787_s20 = scalar_lea.vmem %s163_s6, 16  ;;  %s2791_s13 = scalar_lea.vmem %s163_s6, 32 }
  0x76   :  { %p2788_p8 = scmp.ne.s32.totalorder %s163_s6, %s2787_s20  ;;  %p2792_p9 = scmp.lt.s32.totalorder %s163_s6, %s163_s6 }
  0x77   :  { %p2793_p10 = scmp.lt.s32.totalorder %s2791_s13, %s2787_s20 }
  0x79   :  { %p2794_p11 = por %p2793_p10, %p2792_p9 }
  0x7b   :  { %p2795_p12 = pnand %p2794_p11, %p2788_p8 }
  0x7d   :  { %2798 = shalt.err (!%p2795_p12)
}
  0x7e   :  { %165 = dma.hbm_to_vmem [thread:$0]  %s3243_s18, 16, %s163_s6, [#allocation17]  }
  0x7f   :  { %2799 = dma.done.wait [#allocation3], 128  }
  0x80   :  { %2800 = vsyncadd [#allocation3], 4294967168 }
  0x81   :  { %2801 = dma.done.wait [#allocation5], 272  }
  0x82   :  { %2802 = vsyncadd [#allocation5], 4294967024 }
  0x83   :  { %2803 = dma.done.wait [#allocation8], 272  }
  0x84   :  { %2804 = vsyncadd [#allocation8], 4294967024 }
  0x85   :  { %2805 = dma.done.wait [#allocation11], 272  }
  0x86   :  { %2806 = vsyncadd [#allocation11], 4294967024 }
  0x87   :  { %2807 = dma.done.wait [#allocation14], 272  }
  0x88   :  { %2808 = vsyncadd [#allocation14], 4294967024 }
  0x89   :  { %2809 = dma.done.wait [#allocation17], 272  }
  0x8a   :  { %2810 = vsyncadd [#allocation17], 4294967024  ;;  %vm207_vm0 = vcmask 261120   ;;  %s3251_s9 = sld [smem:[#allocation26_spill]]  ;;  %v305_v8 = vld [vmem:[#allocation2] sm:$0xff]  ;;  %vm313_vm1 = vcmask 64512  }
  0x8b   :  { %s3252_s11 = sld [smem:[#allocation25_spill]]  ;;  %2358 = vmatprep.subr.mxu1 %v305_v8  ;;  %v501_v13 = vld [vmem:[#allocation4 + $0x8] sm:$0xff]  ;;  %v2162_v16 = vld [vmem:[%s3230_s5] ss:$0 sm:$0xff]  ;;  %v500_v27 = vld [vmem:[#allocation4] sm:$0xff]  ;;  %s2824_s5 = smov 120  }
  0x8c   :  { %2359 = vmatpush3.msra.mxu1 %v305_v8  ;;  %vm509_vm2 = vcmask 130048   ;;  %v2825_v32 = vmov 0.0   ;;  %vm2826_vm3 = vmmov 0   ;;  %v2171_v35 = vld [vmem:[#allocation6] ss:$0 sm:$0xff]  ;;  %s3253_s20 = sld [smem:[#allocation27_spill]] }
  0x8d   :  { %v685_v48 = vld [vmem:[%s3233_s8] sm:$0xff]  ;;  %v822_v52 = vld [vmem:[#allocation10] sm:$0xff]  ;;  %v2177_v55 = vld [vmem:[#allocation7] ss:$0 sm:$0xff]  ;;  %s3254_s16 = sld [smem:[#allocation28_spill]] }
  0x90   :  { %v2978_v0 = vld [vmem:[%s3251_s9 + $0x18] sm:$0xff]  ;;  %v2983_v1 = vld [vmem:[%s3251_s9 + $0x10] sm:$0xff]  ;;  %v204_v3 = vld [vmem:[%s3251_s9 + $0x8] sm:$0xff] }
  0x91   :  { %2344 = vmatprep.subr.mxu0 %v2978_v0  ;;  %v2989_v2 = vld [vmem:[%s3252_s11] sm:$0xff]  ;;  %v3005_v5 = vld [vmem:[%s3252_s11 + $0x8] sm:$0xff]  ;;  %v3010_v6 = vld [vmem:[%s3252_s11 + $0x10] sm:$0xff]  ;;  %701 = vrot.lane.b32.xlu1 %v2983_v1, %s2824_s5 }
  0x92   :  { %2345 = vmatpush3.msra.mxu0 %v2978_v0  ;;  %2352 = vmatprep.mubr.msk.f32.mxu0 %vm207_vm0, %v2989_v2  ;;  %v203_v4 = vld [vmem:[%s3251_s9] sm:$0xff]  ;;  %v3019_v7 = vld [vmem:[%s3252_s11 + $0x18] sm:$0xff] }
  0x93   :  { %2346 = vmatprep.subr.mxu0 %v2983_v1  ;;  %697 = vrot.lane.b32.xlu0 %v203_v4, %s2824_s5  ;;  %v611_v47 = vld [vmem:[%s3253_s20] sm:$0xff] }
  0x94   :  { %2347 = vmatpush3.msra.mxu0 %v2983_v1 }
  0x95   :  { %2348 = vmatprep.subr.mxu0 %v204_v3  ;;  %703 = vrot.lane.b32.xlu1 %v2978_v0, %s2824_s5 }
  0x96   :  { %2349 = vmatpush3.msra.mxu0 %v204_v3 }
  0x97   :  { %2350 = vmatprep.subr.mxu0 %v203_v4  ;;  %699 = vrot.lane.b32.xlu0 %v204_v3, %s2824_s5 }
  0x98   :  { %2351 = vmatpush3.msra.mxu0 %v203_v4 }
  0x99   :  { %2353 = vmatmul.mubr.msk.f32.vlgmr.msra.gmra.mxu0 %vm207_vm0, %v3005_v5  ;;  %2380 = vmatprep.subr.mxu0 %v501_v13 }
  0x9a   :  { %2355 = vmatprep.mubr.msk.f32.mxu0 %vm207_vm0, %v3010_v6  ;;  %2381 = vmatpush3.msra.mxu0 %v501_v13 }
  0x9b   :  { %2382 = vmatprep.subr.mxu0 %v500_v27 }
  0x9c   :  { %2383 = vmatpush3.msra.mxu0 %v500_v27  ;;  %v3098_v27 = vld [vmem:[%s3254_s16] sm:$0xff] }
  0x9d   :  { %2356 = vmatmul.mubr.msk.f32.gmra.mxu0 %vm207_vm0, %v3019_v7 }
 0x103   :  { %v702_v49 = vpop.permute.xlu1 %701 }
 0x105   :  { %v698_v45 = vpop.permute.xlu0 %697 }
 0x107   :  { %v704_v51 = vpop.permute.xlu1 %703 }
 0x109   :  { %v700_v50 = vpop.permute.xlu0 %699 }
 0x159   :  { %v2354_v9 = vpop.f32.mrf.mxu0 }
 0x15b   :  { %v286_v10 = vpop.f32.mrf.mxu0 }
 0x15c   :  { %2360 = vmatprep.mubr.msk.f32.mxu1 %vm313_vm1, %v286_v10 }
 0x15d   :  { %v2357_v11 = vpop.f32.mrf.mxu0  ;;  %2361 = vmatmul.mubr.msk.f32.vlgmr.msra.gmra.mxu1 %vm313_vm1, %v2354_v9 }
 0x15f   :  { %v296_v12 = vpop.f32.mrf.mxu0 }
 0x160   :  { %2363 = vmatprep.mubr.msk.f32.mxu1 %vm313_vm1, %v296_v12 }
 0x161   :  { %2364 = vmatmul.mubr.msk.f32.gmra.mxu1 %vm313_vm1, %v2357_v11 }
 0x162   :  { %2374 = vmatprep.mubr.msk.f32.mxu1 %vm207_vm0, %v2989_v2 }
 0x21d   :  { %v2362_v14 = vpop.f32.mrf.mxu1 }
 0x21e   :  { %v398_v20 = vadd.f32 %v2362_v14, %v2162_v16 }
 0x21f   :  { %v392_v15 = vpop.f32.mrf.mxu1 }
 0x220   :  { %v393_v23 = vadd.f32 %v2162_v16, %v392_v15  ;;  %v412_v25 = vmax.f32 %v398_v20, 0.0  ;;  %v823_v20 = vld [vmem:[#allocation10 + $0x8] sm:$0xff] }
 0x221   :  { %v2365_v17 = vpop.f32.mrf.mxu1 }
 0x222   :  { %v408_v18 = vadd.f32 %v2365_v17, %v2162_v16  ;;  %v411_v26 = vmax.f32 %v393_v23, 0.0 }
 0x223   :  { %v402_v19 = vpop.f32.mrf.mxu1 }
 0x224   :  { %v414_v21 = vmax.f32 %v408_v18, 0.0  ;;  %v403_v22 = vadd.f32 %v2162_v16, %v402_v19 }
 0x226   :  { %v413_v24 = vmax.f32 %v403_v22, 0.0  ;;  %2366 = vmatprep.subr.mxu1 %v414_v21  ;;  %v3078_v22 = vld [vmem:[#allocation9 + $0x8] sm:$0xff] }
 0x227   :  { %2367 = vmatpush3.msra.mxu1 %v414_v21  ;;  %v3076_v21 = vld [vmem:[#allocation9] sm:$0xff] }
 0x228   :  { %2368 = vmatprep.subr.mxu1 %v413_v24 }
 0x229   :  { %2369 = vmatpush3.msra.mxu1 %v413_v24 }
 0x22a   :  { %2370 = vmatprep.subr.mxu1 %v412_v25 }
 0x22b   :  { %2371 = vmatpush3.msra.mxu1 %v412_v25 }
 0x22c   :  { %2372 = vmatprep.subr.mxu1 %v411_v26 }
 0x22d   :  { %2373 = vmatpush3.msra.mxu1 %v411_v26 }
 0x22e   :  { %2375 = vmatmul.mubr.msk.f32.vlgmr.msra.gmra.mxu1 %vm207_vm0, %v3005_v5  ;;  %2390 = vmatprep.subr.mxu1 %v2825_v32 }
 0x22f   :  { %2377 = vmatprep.mubr.msk.f32.mxu1 %vm207_vm0, %v3010_v6 }
 0x232   :  { %2378 = vmatmul.mubr.msk.f32.gmra.mxu1 %vm207_vm0, %v3019_v7 }
 0x233   :  { %2398 = vmatprep.mubr.msk.f32.mxu1 %vm2826_vm3, %v2825_v32 }
 0x2ee   :  { %v2376_v28 = vpop.f32.mrf.mxu1 }
 0x2f0   :  { %v481_v29 = vpop.f32.mrf.mxu1 }
 0x2f1   :  { %2384 = vmatprep.mubr.msk.f32.mxu0 %vm509_vm2, %v481_v29 }
 0x2f2   :  { %v2379_v30 = vpop.f32.mrf.mxu1  ;;  %2385 = vmatmul.mubr.msk.f32.vlgmr.msra.gmra.mxu0 %vm509_vm2, %v2376_v28 }
 0x2f4   :  { %v491_v31 = vpop.f32.mrf.mxu1 }
 0x2f5   :  { %2387 = vmatprep.mubr.msk.f32.mxu0 %vm509_vm2, %v491_v31 }
 0x2f6   :  { %2388 = vmatmul.mubr.msk.f32.gmra.mxu0 %vm509_vm2, %v2379_v30 }
 0x2f7   :  { %2417 = vmatprep.mubr.msk.f32.mxu0 %vm509_vm2, %v822_v52 }
 0x3b2   :  { %v2386_v33 = vpop.f32.mrf.mxu0 }
 0x3b3   :  { %v594_v39 = vadd.f32 %v2386_v33, %v2171_v35 }
 0x3b4   :  { %v588_v34 = vpop.f32.mrf.mxu0 }
 0x3b5   :  { %v589_v42 = vadd.f32 %v2171_v35, %v588_v34  ;;  %v608_v44 = vmax.f32 %v594_v39, 0.0 }
 0x3b6   :  { %v2389_v36 = vpop.f32.mrf.mxu0 }
 0x3b7   :  { %v604_v37 = vadd.f32 %v2389_v36, %v2171_v35  ;;  %v607_v46 = vmax.f32 %v589_v42, 0.0  ;;  %v1001_v42 = vld [vmem:[%s3237_s12] sm:$0xff] }
 0x3b8   :  { %v598_v38 = vpop.f32.mrf.mxu0 }
 0x3b9   :  { %v610_v40 = vmax.f32 %v604_v37, 0.0  ;;  %v599_v41 = vadd.f32 %v2171_v35, %v598_v38 }
 0x3bb   :  { %v609_v43 = vmax.f32 %v599_v41, 0.0  ;;  %2391 = vmatpush3.msra.mxu1 %v610_v40  ;;  %v1002_v40 = vld [vmem:[%s3237_s12 + $0x8] sm:$0xff] }
 0x3bc   :  { %2392 = vmatprep.subr.mxu1 %v2825_v32 }
 0x3bd   :  { %2393 = vmatpush3.msra.mxu1 %v609_v43 }
 0x3be   :  { %2394 = vmatprep.subr.mxu1 %v2825_v32 }
 0x3bf   :  { %2395 = vmatpush3.msra.mxu1 %v608_v44 }
 0x3c0   :  { %2396 = vmatprep.subr.mxu1 %v2825_v32 }
 0x3c1   :  { %2397 = vmatpush3.msra.mxu1 %v607_v46 }
 0x3c2   :  { %2399 = vmatmul.mubr.msk.f32.vlgmr.msra.gmra.mxu1 %vm207_vm0, %v611_v47  ;;  %2401 = vmatprep.subr.mxu1 %v685_v48 }
 0x3c3   :  { %2402 = vmatpush3.msra.mxu1 %v685_v48  ;;  %2403 = vmatprep.mubr.msk.f32.mxu1 %vm313_vm1, %v698_v45 }
 0x3c4   :  { %2420 = vmatprep.subr.mxu1 %v2825_v32 }
 0x3c6   :  { %2404 = vmatmul.mubr.msk.f32.vlgmr.msra.gmra.mxu1 %vm313_vm1, %v700_v50 }
 0x3c7   :  { %2406 = vmatprep.mubr.msk.f32.mxu1 %vm313_vm1, %v702_v49 }
 0x3ca   :  { %2407 = vmatmul.mubr.msk.f32.gmra.mxu1 %vm313_vm1, %v704_v51 }
 0x3cb   :  { %2424 = vmatprep.mubr.msk.f32.mxu1 %vm2826_vm3, %v2825_v32 }
 0x482   :  { %v3065_v53 = vpop.f32.mrf.mxu1 }
 0x484   :  { %v2400_v54 = vpop.f32.mrf.mxu1 }
 0x486   :  { %v2405_v56 = vpop.f32.mrf.mxu1 }
 0x487   :  { %v785_v57 = vadd.f32 %v2405_v56, %v2177_v55  ;;  %v1906_v56 = vld [vmem:[%s3239_s14] sm:$0xff] }
 0x488   :  { %v779_v58 = vpop.f32.mrf.mxu1 }
 0x489   :  { %v2183_v61 = vmul.f32 -1.442695, %v785_v57  ;;  %v780_v63 = vadd.f32 %v2177_v55, %v779_v58 }
 0x48a   :  { %v2408_v59 = vpop.f32.mrf.mxu1 }
 0x48b   :  { %v795_v60 = vadd.f32 %v2408_v59, %v2177_v55  ;;  %v2182_v4 = vmul.f32 -1.442695, %v780_v63  ;;  %v2229_v63 = vld [vmem:[%s3237_s12 + $0x20] sm:$0xff] }
 0x48c   :  { %v789_v62 = vpop.f32.mrf.mxu1 }
 0x48d   :  { %v2185_v0 = vmul.f32 -1.442695, %v795_v60  ;;  %v790_v1 = vadd.f32 %v2177_v55, %v789_v62  ;;  %v1907_v55 = vld [vmem:[%s3239_s14 + $0x8] sm:$0xff] }
 0x48f   :  { %2563 = vpow2.f32 %v2185_v0  ;;  %v2184_v3 = vmul.f32 -1.442695, %v790_v1 }
 0x490   :  { %2565 = vpow2.f32 %v2183_v61 }
 0x491   :  { %2567 = vpow2.f32 %v2184_v3  ;;  %v1909_v3 = vld [vmem:[#allocation13 + $0x8] sm:$0xff] }
 0x492   :  { %2569 = vpow2.f32 %v2182_v4  ;;  %v1908_v4 = vld [vmem:[#allocation13] sm:$0xff] }
 0x49c   :  { %v2564_v8 = vpop.eup %2563 }
 0x49d   :  { %v2566_v9 = vpop.eup %2565  ;;  %v813_v10 = vadd.f32 1.0, %v2564_v8 }
 0x49e   :  { %v2568_v11 = vpop.eup %2567  ;;  %v811_v13 = vadd.f32 1.0, %v2566_v9  ;;  %v2232_v9 = vld [vmem:[#allocation12] ss:$0 sm:$0xff] }
 0x49f   :  { %2571 = vrcp.f32 %v813_v10  ;;  %v812_v12 = vadd.f32 1.0, %v2568_v11  ;;  %v2570_v14 = vpop.eup %2569 }
 0x4a0   :  { %v810_v15 = vadd.f32 1.0, %v2570_v14  ;;  %v2066_v14 = vld [vmem:[#allocation16 + $0x8] sm:$0xff] }
 0x4a1   :  { %2573 = vrcp.f32 %v812_v12 }
 0x4a2   :  { %2575 = vrcp.f32 %v811_v13 }
 0x4a3   :  { %2577 = vrcp.f32 %v810_v15  ;;  %v2065_v15 = vld [vmem:[#allocation16] sm:$0xff] }
 0x4ac   :  { %v2572_v16 = vpop.eup %2571 }
 0x4ad   :  { %2409 = vmatprep.subr.msk.mxu0 %vm509_vm2, %v2572_v16 }
 0x4ae   :  { %v2574_v17 = vpop.eup %2573  ;;  %2410 = vmatpush3.xpose.msk.msra.mxu0 %vm509_vm2, %v2572_v16 }
 0x4af   :  { %2411 = vmatprep.subr.msk.mxu0 %vm509_vm2, %v2574_v17  ;;  %v2576_v18 = vpop.eup %2575 }
 0x4b0   :  { %v2578_v19 = vpop.eup %2577 }
 0x4b2   :  { %2412 = vmatpush3.xpose.msk.msra.mxu0 %vm509_vm2, %v2574_v17 }
 0x4b3   :  { %2413 = vmatprep.subr.msk.mxu0 %vm509_vm2, %v2576_v18 }
 0x4b6   :  { %2414 = vmatpush3.xpose.msk.msra.mxu0 %vm509_vm2, %v2576_v18 }
 0x4b7   :  { %2415 = vmatprep.subr.msk.mxu0 %vm509_vm2, %v2578_v19 }
 0x4ba   :  { %2416 = vmatpush3.xpose.msk.msra.mxu0 %vm509_vm2, %v2578_v19 }
 0x4bb   :  { %2441 = vmatprep.subr.mxu0 %v823_v20 }
 0x4bd   :  { %2418 = vmatmul.mubr.msk.f32.vlgmr.msra.gmra.mxu0 %vm509_vm2, %v823_v20 }
 0x4be   :  { %2442 = vmatpush3.msra.mxu0 %v823_v20  ;;  %2445 = vmatprep.mubr.msk.f32.mxu0 %vm509_vm2, %v3076_v21 }
 0x4bf   :  { %2443 = vmatprep.subr.mxu0 %v822_v52 }
 0x4c0   :  { %2444 = vmatpush3.msra.mxu0 %v822_v52 }
 0x4c1   :  { %2446 = vmatmul.mubr.msk.f32.vlgmr.msra.gmra.mxu0 %vm509_vm2, %v3078_v22 }
 0x57d   :  { %v3084_v23 = vpop.f32.mrf.mxu0 }
 0x57e   :  { %v921_v24 = vmul.f32 %v3084_v23, %v3084_v23 }
 0x57f   :  { %v3088_v25 = vpop.f32.mrf.mxu0 }
 0x580   :  { %2421 = vmatpush3.xpose.msk.msra.mxu1 %vm207_vm0, %v921_v24  ;;  %v920_v26 = vmul.f32 %v3088_v25, %v3088_v25 }
 0x581   :  { %2422 = vmatprep.subr.mxu1 %v2825_v32  ;;  %v2447_v28 = vpop.f32.mrf.mxu0 }
 0x583   :  { %v3113_v29 = vpop.f32.mrf.mxu0 }
 0x584   :  { %2423 = vmatpush3.xpose.msk.msra.mxu1 %vm207_vm0, %v920_v26  ;;  %2456 = vmatprep.mubr.msk.f32.mxu0 %vm509_vm2, %v3113_v29 }
 0x585   :  { %2427 = vmatprep.subr.mxu1 %v2572_v16 }
 0x587   :  { %2425 = vmatmul.mubr.msk.f32.vlgmr.msra.gmra.mxu1 %vm207_vm0, %v3098_v27 }
 0x588   :  { %2428 = vmatpush3.msra.mxu1 %v2572_v16  ;;  %2435 = vmatprep.mubr.msk.f32.mxu1 %vm207_vm0, %v2989_v2 }
 0x589   :  { %2429 = vmatprep.subr.mxu1 %v2574_v17 }
 0x58a   :  { %2430 = vmatpush3.msra.mxu1 %v2574_v17  ;;  %v2235_v17 = vld [vmem:[#allocation15] ss:$0 sm:$0xff] }
 0x58b   :  { %2431 = vmatprep.subr.mxu1 %v2576_v18 }
 0x58c   :  { %2432 = vmatpush3.msra.mxu1 %v2576_v18 }
 0x58d   :  { %2433 = vmatprep.subr.mxu1 %v2578_v19 }
 0x58e   :  { %2434 = vmatpush3.msra.mxu1 %v2578_v19 }
 0x58f   :  { %2436 = vmatmul.mubr.msk.f32.vlgmr.msra.gmra.mxu1 %vm207_vm0, %v3005_v5  ;;  %2459 = vmatprep.subr.mxu1 %v2825_v32 }
 0x590   :  { %2438 = vmatprep.mubr.msk.f32.mxu1 %vm207_vm0, %v3010_v6 }
 0x593   :  { %2439 = vmatmul.mubr.msk.f32.gmra.mxu1 %vm207_vm0, %v3019_v7 }
 0x594   :  { %2463 = vmatprep.mubr.msk.f32.mxu1 %vm2826_vm3, %v2825_v32 }
 0x647   :  { %v997_v30 = vpop.f32.mrf.mxu1 }
 0x649   :  { %v2426_v31 = vpop.f32.mrf.mxu1 }
 0x64f   :  { %v2437_v33 = vpop.f32.mrf.mxu1 }
 0x651   :  { %v1069_v34 = vpop.f32.mrf.mxu1 }
 0x653   :  { %v2440_v35 = vpop.f32.mrf.mxu1 }
 0x654   :  { %2448 = vmatprep.subr.msk.mxu0 %vm509_vm2, %v2440_v35 }
 0x655   :  { %v1079_v36 = vpop.f32.mrf.mxu1  ;;  %2449 = vmatpush3.xpose.msk.msra.mxu0 %vm509_vm2, %v2440_v35 }
 0x656   :  { %2450 = vmatprep.subr.msk.mxu0 %vm509_vm2, %v1079_v36 }
 0x659   :  { %2451 = vmatpush3.xpose.msk.msra.mxu0 %vm509_vm2, %v1079_v36 }
 0x65a   :  { %2452 = vmatprep.subr.msk.mxu0 %vm509_vm2, %v2437_v33 }
 0x65d   :  { %2453 = vmatpush3.xpose.msk.msra.mxu0 %vm509_vm2, %v2437_v33 }
 0x65e   :  { %2454 = vmatprep.subr.msk.mxu0 %vm509_vm2, %v1069_v34 }
 0x661   :  { %2455 = vmatpush3.xpose.msk.msra.mxu0 %vm509_vm2, %v1069_v34 }
 0x662   :  { %2480 = vmatprep.subr.mxu0 %v2440_v35 }
 0x664   :  { %2457 = vmatmul.mubr.msk.f32.vlgmr.msra.gmra.mxu0 %vm509_vm2, %v2447_v28 }
 0x665   :  { %2481 = vmatpush3.msra.mxu0 %v2440_v35  ;;  %2488 = vmatprep.mubr.msk.f32.mxu0 %vm207_vm0, %v2989_v2 }
 0x666   :  { %2482 = vmatprep.subr.mxu0 %v1079_v36 }
 0x667   :  { %2483 = vmatpush3.msra.mxu0 %v1079_v36 }
 0x668   :  { %2484 = vmatprep.subr.mxu0 %v2437_v33 }
 0x669   :  { %2485 = vmatpush3.msra.mxu0 %v2437_v33 }
 0x66a   :  { %2486 = vmatprep.subr.mxu0 %v1069_v34 }
 0x66b   :  { %2487 = vmatpush3.msra.mxu0 %v1069_v34 }
 0x66c   :  { %2489 = vmatmul.mubr.msk.f32.vlgmr.msra.gmra.mxu0 %vm207_vm0, %v3005_v5  ;;  %2512 = vmatprep.subr.mxu0 %v2825_v32 }
 0x66d   :  { %2491 = vmatprep.mubr.msk.f32.mxu0 %vm207_vm0, %v3010_v6  ;;  %v2211_v6 = vld [vmem:[%s3237_s12 + $0x18] sm:$0xff] }
 0x670   :  { %2492 = vmatmul.mubr.msk.f32.gmra.mxu0 %vm207_vm0, %v3019_v7  ;;  %v2210_v7 = vld [vmem:[%s3237_s12 + $0x10] sm:$0xff] }
 0x671   :  { %2516 = vmatprep.mubr.msk.f32.mxu0 %vm2826_vm3, %v2825_v32 }
 0x724   :  { %v2458_v2 = vpop.f32.mrf.mxu0 }
 0x725   :  { %v1263_v37 = vmul.f32 %v2458_v2, %v3084_v23 }
 0x726   :  { %v1253_v38 = vpop.f32.mrf.mxu0 }
 0x727   :  { %2460 = vmatpush3.xpose.msk.msra.mxu1 %vm207_vm0, %v1263_v37  ;;  %v1262_v5 = vmul.f32 %v1253_v38, %v3088_v25 }
 0x728   :  { %2461 = vmatprep.subr.mxu1 %v2825_v32 }
 0x72b   :  { %2462 = vmatpush3.xpose.msk.msra.mxu1 %vm207_vm0, %v1262_v5 }
 0x72c   :  { %2466 = vmatprep.subr.mxu1 %v2825_v32  ;;  %v2490_v39 = vpop.f32.mrf.mxu0 }
 0x72e   :  { %2464 = vmatmul.mubr.msk.f32.vlgmr.msra.gmra.mxu1 %vm207_vm0, %v3098_v27  ;;  %v1555_v44 = vpop.f32.mrf.mxu0 }
 0x72f   :  { %2467 = vmatpush3.msra.mxu1 %v2211_v6  ;;  %2470 = vmatprep.mubr.msk.f32.mxu1 %vm2826_vm3, %v2825_v32 }
 0x730   :  { %2468 = vmatprep.subr.mxu1 %v2825_v32  ;;  %v2493_v45 = vpop.f32.mrf.mxu0 }
 0x731   :  { %2469 = vmatpush3.msra.mxu1 %v2210_v7 }
 0x732   :  { %2473 = vmatprep.subr.mxu1 %v2825_v32  ;;  %v1565_v46 = vpop.f32.mrf.mxu0 }
 0x7ee   :  { %v1336_v41 = vpop.f32.mrf.mxu1 }
 0x7ef   :  { %2471 = vmatmul.mubr.msk.f32.vlgmr.msra.gmra.mxu1 %vm509_vm2, %v1336_v41 }
 0x7f0   :  { %2474 = vmatpush3.msra.mxu1 %v1002_v40  ;;  %v2465_v43 = vpop.f32.mrf.mxu1  ;;  %2477 = vmatprep.mubr.msk.f32.mxu1 %vm2826_vm3, %v2825_v32 }
 0x7f1   :  { %2475 = vmatprep.subr.mxu1 %v2825_v32 }
 0x7f2   :  { %2476 = vmatpush3.msra.mxu1 %v1001_v42 }
 0x7f3   :  { %2494 = vmatprep.subr.mxu1 %v2447_v28  ;;  %2478 = vmatmul.mubr.msk.f32.vlgmr.msra.gmra.mxu1 %vm509_vm2, %v997_v30 }
 0x7f4   :  { %2495 = vmatpush3.msra.mxu1 %v2447_v28  ;;  %2498 = vmatprep.mubr.msk.f32.mxu1 %vm509_vm2, %v3076_v21 }
 0x7f5   :  { %2496 = vmatprep.subr.mxu1 %v3113_v29 }
 0x7f6   :  { %2497 = vmatpush3.msra.mxu1 %v3113_v29 }
 0x7f7   :  { %2499 = vmatmul.mubr.msk.f32.vlgmr.msra.gmra.mxu1 %vm509_vm2, %v3078_v22  ;;  %2501 = vmatprep.subr.msk.mxu1 %vm509_vm2, %v2493_v45  ;;  %v2236_v22 = vld [vmem:[#allocation18] ss:$0 sm:$0xff] }
 0x7f8   :  { %2502 = vmatpush3.xpose.msk.msra.mxu1 %vm509_vm2, %v2493_v45 }
 0x7f9   :  { %2503 = vmatprep.subr.msk.mxu1 %vm509_vm2, %v1565_v46 }
 0x7fc   :  { %2504 = vmatpush3.xpose.msk.msra.mxu1 %vm509_vm2, %v1565_v46 }
 0x7fd   :  { %2505 = vmatprep.subr.msk.mxu1 %vm509_vm2, %v2490_v39 }
 0x800   :  { %2506 = vmatpush3.xpose.msk.msra.mxu1 %vm509_vm2, %v2490_v39 }
 0x801   :  { %2507 = vmatprep.subr.msk.mxu1 %vm509_vm2, %v1555_v44 }
 0x804   :  { %2508 = vmatpush3.xpose.msk.msra.mxu1 %vm509_vm2, %v1555_v44 }
 0x805   :  { %2533 = vmatprep.subr.mxu1 %v2825_v32 }
 0x8af   :  { %v1412_v47 = vpop.f32.mrf.mxu1 }
 0x8b1   :  { %v2472_v48 = vpop.f32.mrf.mxu1 }
 0x8b3   :  { %v1485_v49 = vpop.f32.mrf.mxu1 }
 0x8b4   :  { %v1486_v50 = vadd.f32 %v1485_v49, %v1412_v47 }
 0x8b5   :  { %v2479_v51 = vpop.f32.mrf.mxu1 }
 0x8b7   :  { %v2500_v52 = vpop.f32.mrf.mxu1 }
 0x8b9   :  { %v1640_v54 = vpop.f32.mrf.mxu1 }
 0x8ba   :  { %2509 = vmatprep.mubr.msk.f32.mxu1 %vm509_vm2, %v1640_v54 }
 0x8bb   :  { %2510 = vmatmul.mubr.msk.f32.vlgmr.msra.gmra.mxu1 %vm509_vm2, %v2500_v52 }
 0x8bc   :  { %2534 = vmatpush3.msra.mxu1 %v1907_v55  ;;  %2537 = vmatprep.mubr.msk.f32.mxu1 %vm2826_vm3, %v2825_v32 }
 0x8bd   :  { %2535 = vmatprep.subr.mxu1 %v2825_v32 }
 0x8be   :  { %2536 = vmatpush3.msra.mxu1 %v1906_v56 }
 0x8bf   :  { %2538 = vmatmul.mubr.msk.f32.vlgmr.msra.gmra.mxu1 %vm509_vm2, %v3065_v53  ;;  %v2230_v53 = vld [vmem:[%s3237_s12 + $0x28] sm:$0xff] }
 0x97b   :  { %v2511_v57 = vpop.f32.mrf.mxu1 }
 0x97c   :  { %v1743_v58 = vmul.f32 %v2511_v57, %v3084_v23 }
 0x97d   :  { %v1733_v59 = vpop.f32.mrf.mxu1 }
 0x97e   :  { %2513 = vmatpush3.xpose.msk.msra.mxu0 %vm207_vm0, %v1743_v58  ;;  %v1742_v61 = vmul.f32 %v1733_v59, %v3088_v25 }
 0x97f   :  { %v2052_v60 = vpop.f32.mrf.mxu1  ;;  %2514 = vmatprep.subr.mxu0 %v2825_v32 }
 0x981   :  { %v2539_v62 = vpop.f32.mrf.mxu1 }
 0x982   :  { %2515 = vmatpush3.xpose.msk.msra.mxu0 %vm207_vm0, %v1742_v61 }
 0x983   :  { %2519 = vmatprep.subr.mxu0 %v2825_v32 }
 0x985   :  { %2517 = vmatmul.mubr.msk.f32.vlgmr.msra.gmra.mxu0 %vm207_vm0, %v3098_v27 }
 0x986   :  { %2520 = vmatpush3.msra.mxu0 %v2230_v53  ;;  %2523 = vmatprep.mubr.msk.f32.mxu0 %vm2826_vm3, %v2825_v32 }
 0x987   :  { %2521 = vmatprep.subr.mxu0 %v2825_v32 }
 0x988   :  { %2522 = vmatpush3.msra.mxu0 %v2229_v63 }
 0x989   :  { %2526 = vmatprep.subr.mxu0 %v2825_v32 }
 0xa45   :  { %v1816_v0 = vpop.f32.mrf.mxu0 }
 0xa46   :  { %2524 = vmatmul.mubr.msk.f32.vlgmr.msra.gmra.mxu0 %vm509_vm2, %v1816_v0 }
 0xa47   :  { %v2518_v1 = vpop.f32.mrf.mxu0  ;;  %2530 = vmatprep.mubr.msk.f32.mxu0 %vm2826_vm3, %v2825_v32  ;;  %2527 = vmatpush3.msra.mxu0 %v1909_v3 }
 0xa48   :  { %2528 = vmatprep.subr.mxu0 %v2825_v32 }
 0xa49   :  { %2529 = vmatpush3.msra.mxu0 %v1908_v4 }
 0xa4a   :  { %2540 = vmatprep.subr.mxu0 %v2825_v32 }
 0xb06   :  { %v1892_v8 = vpop.f32.mrf.mxu0 }
 0xb07   :  { %v1896_v10 = vadd.f32 %v1892_v8, %v1486_v50 }
 0xb08   :  { %v2525_v11 = vpop.f32.mrf.mxu0 }
 0xb09   :  { %v1904_v12 = vadd.f32 %v2232_v9, %v1896_v10 }
 0xb0b   :  { %v1905_v13 = vmax.f32 %v1904_v12, 0.0 }
 0xb0d   :  { %2531 = vmatmul.mubr.msk.f32.vlgmr.msra.gmra.mxu0 %vm509_vm2, %v1905_v13 }
 0xb0e   :  { %2544 = vmatprep.mubr.msk.f32.mxu0 %vm2826_vm3, %v2825_v32  ;;  %2541 = vmatpush3.msra.mxu0 %v2066_v14 }
 0xb0f   :  { %2542 = vmatprep.subr.mxu0 %v2825_v32 }
 0xb10   :  { %2543 = vmatpush3.msra.mxu0 %v2065_v15 }
 0xbcd   :  { %v1979_v16 = vpop.f32.mrf.mxu0 }
 0xbce   :  { %v2053_v18 = vadd.f32 %v2052_v60, %v1979_v16 }
 0xbcf   :  { %v2532_v19 = vpop.f32.mrf.mxu0 }
 0xbd0   :  { %v2063_v20 = vadd.f32 %v2235_v17, %v2053_v18 }
 0xbd2   :  { %v2064_v21 = vmax.f32 %v2063_v20, 0.0 }
 0xbd4   :  { %2545 = vmatmul.mubr.msk.f32.vlgmr.msra.gmra.mxu0 %vm509_vm2, %v2064_v21 }
 0xc94   :  { %v2143_v23 = vpop.f32.mrf.mxu0 }
 0xc95   :  { %v2144_v24 = vadd.f32 %v2236_v22, %v2143_v23 }
 0xc96   :  { %v2546_v25 = vpop.f32.mrf.mxu0 }
 0xc97   :  { %2147 = vst [vmem:[%s3244_s19] sm:$0xff] %v2144_v24 }
 0xc98   :  { %2152 = vsyncpa [#allocation3], 1 }
 0xc99   :  { %2153 = vsyncpa [#allocation5], 1 }
 0xc9a   :  { %2154 = vsyncpa [#allocation8], 1 }
 0xc9b   :  { %2155 = vsyncpa [#allocation11], 1 }
 0xc9c   :  { %2156 = vsyncpa [#allocation14], 1 }
 0xc9d   :  { %2157 = vsyncpa [#allocation17], 1 }

</bundles_post_ra>
